<compile_context>
chip_gen: v6e
topology: v6e:2x2x1
jax: 0.10.0
libtpu: 0.0.40
codegen_flags: <defaults>
</compile_context>

<pallas_src>
import functools

import jax
import jax.numpy as jnp
from jax import lax
from jax.experimental import pallas as pl
from jax.experimental.pallas import tpu as pltpu

EPS = 1e-5
NEG_SLOPE = 0.1


def _round_up(x, m):
    return (x + m - 1) // m * m


def _vmem_limit_bytes():
    """Explicit per-chip VMEM limit (v5e/v6e 128 MiB physical, v7x 64 MiB)."""
    cap = 64 * 1024 * 1024
    try:
        info = pltpu.get_tpu_info()
        cap = int(getattr(info, "vmem_capacity_bytes", cap))
    except Exception:
        pass
    return max(32 * 1024 * 1024, min(cap * 3 // 4, 100 * 1024 * 1024))


def _conv_stats_kernel(ya_ref, yb_ref, w_ref, b_ref, conv_ref, stats_ref, *,
                       ow, oc, gemm_dtype):
    """Pass 1: in-VMEM im2col + conv GEMM (+bias).

    Emits the unpadded pre-BN activation (TM, OC) and per-tile BN partial
    sums / sums-of-squares.  The k=4,s=2 conv is expressed on the
    space-to-depth(2) input as a 2x2 stride-1 conv with 4C channels:
      out[oh, ow] = sum_{a,b in {0,1}} y[oh+a, ow+b, :] @ Wq[2a+b]
    ya holds row pairs r = oh (a=0), yb holds row pairs r = oh+1 (a=1); the
    kw phase b is a static column slice, so no strided gathers are needed.
    """
    toh = ya_ref.shape[1]
    c4 = ya_ref.shape[3]
    tm = toh * ow

    # Assemble in f32 so the (TOH, OW, 4C) -> (TM, 4C) collapse is a trivial
    # 32-bit shape cast (OW is a multiple of the 8-sublane tile here).
    ya = ya_ref[0].astype(jnp.float32)            # (TOH, OW+1, 4C)
    yb = yb_ref[0].astype(jnp.float32)

    acc = jnp.zeros((tm, w_ref.shape[2]), dtype=jnp.float32)
    pieces = (ya[:, 0:ow, :], ya[:, 1:ow + 1, :],       # a=0, b=0/1
              yb[:, 0:ow, :], yb[:, 1:ow + 1, :])       # a=1, b=0/1
    for v, piece in enumerate(pieces):
        lhs = piece.reshape(tm, c4).astype(gemm_dtype)
        acc = acc + jnp.dot(lhs, w_ref[v], preferred_element_type=jnp.float32)
    acc = acc + b_ref[...]                               # bias, (1, OCp)

    # Unpadded activation store (last dim == OC == full array dim).
    conv_ref[0] = acc[:, :oc].astype(conv_ref.dtype)

    # BN partial stats.  TOH divides OH (picked on host), so every tile is
    # full and no validity masking is needed (fast path per review).  Padded
    # channels have zero weight+bias -> exactly zero contributions.
    s = jnp.sum(acc, axis=0, keepdims=True)              # (1, OCp)
    ss = jnp.sum(acc * acc, axis=0, keepdims=True)       # (1, OCp)
    ridx = lax.broadcasted_iota(jnp.int32, (8, acc.shape[1]), 0)
    stats_ref[0, 0] = jnp.where(ridx == 0, s, 0.0) + jnp.where(ridx == 1, ss, 0.0)


def _bn_act_kernel(conv_ref, scale_ref, shift_ref, o_ref):
    """Pass 2: fused BN scale/shift + LeakyReLU(0.1) on the unpadded activation."""
    y = conv_ref[...].astype(jnp.float32) * scale_ref[...] + shift_ref[...]
    o_ref[...] = jnp.where(y >= 0, y, NEG_SLOPE * y).astype(o_ref.dtype)


def conv2d_block(x, weight, bias, gamma, beta, *,
                 gemm_dtype=jnp.bfloat16, out_dtype=jnp.float32,
                 channels_last=False, return_stats=False, tm_target=2048):
    """x: (N, C, H, W) f32; weight: (OC, C, 4, 4).  Returns NCHW (N, OC, OH, OW)
    by default, or NHWC (lane-dense OC) if channels_last=True."""
    N, C, H, W = x.shape
    OC, C_in, KH, KW = weight.shape
    assert (C_in, KH, KW) == (C, 4, 4)
    S, P = 2, 1
    OH = (H + 2 * P - KH) // S + 1
    OW = (W + 2 * P - KW) // S + 1
    M = N * OH * OW
    C4 = 4 * C                                    # K = KH*KW*C = 4 * C4

    # MXU lane padding only for VMEM-resident weight / accumulator; HBM-visible
    # tensors (activation, output) keep last dim == OC.
    lane = 256 if OC > 128 else 128               # v6e/v7x MXUs are 256 wide
    OCp = _round_up(OC, lane)

    # ---- host glue: NHWC -> pad -> space-to-depth(2) -> two row-shifted views
    x_nhwc = jnp.transpose(x, (0, 2, 3, 1))
    pad_h = 2 * OH + 1 - H                        # pad so there are 2*(OH+1) rows
    pad_w = 2 * OW + 1 - W
    xp = jnp.pad(x_nhwc, ((0, 0), (1, pad_h), (1, pad_w), (0, 0)))
    HY, WY = OH + 1, OW + 1
    y = xp.reshape(N, HY, 2, WY, 2, C).transpose(0, 1, 3, 2, 4, 5)
    y = y.reshape(N, HY, WY, C4).astype(gemm_dtype)
    y_a = y[:, 0:OH]                              # row pair r = oh      (a = 0)
    y_b = y[:, 1:OH + 1]                          # row pair r = oh + 1  (a = 1)

    # weight -> (v = 2a+b, q = di*2C + dj*C + c, OCp)
    w_q = jnp.transpose(weight, (2, 3, 1, 0)).reshape(2, 2, 2, 2, C, OC)
    w_q = jnp.transpose(w_q, (0, 2, 1, 3, 4, 5)).reshape(4, C4, OC)
    w_q = jnp.pad(w_q, ((0, 0), (0, 0), (0, OCp - OC))).astype(gemm_dtype)
    b_p = jnp.pad(bias.astype(jnp.float32).reshape(1, OC),
                  ((0, 0), (0, OCp - OC)))

    # ---- tile selection under an explicit per-chip VMEM budget
    vmem_limit = _vmem_limit_bytes()
    budget = vmem_limit - 4 * 1024 * 1024
    gb = jnp.dtype(gemm_dtype).itemsize

    def _tile_bytes(toh):
        tm = toh * OW
        views = 2 * 2 * toh * WY * C4 * gb            # two views, double-buffered
        convb = 2 * tm * OC * gb                      # activation out block
        statsb = 2 * 8 * OCp * 4
        consts = 2 * (4 * C4 * OCp * gb) + 2 * OCp * 4
        temps = tm * (3 * C4 * 4 + C4 * gb + 2 * OCp * 4)   # f32 pieces + acc
        return views + convb + statsb + consts + temps

    divisors = [d for d in range(1, OH + 1) if OH % d == 0]
    feasible = [d for d in divisors
                if ((d * OW) % 8 == 0 or d == OH) and _tile_bytes(d) <= budget]
    if not feasible:
        feasible = [OH]
    under = [d for d in feasible if d * OW <= tm_target]
    TOH = max(under) if under else min(feasible)
    n_oh = OH // TOH
    if N * n_oh < 2:                              # keep >= 2 grid cells (v7x 2 TCs)
        smaller = [d for d in feasible if d < TOH]
        if smaller:
            TOH = max(smaller)
            n_oh = OH // TOH
    TM = TOH * OW

    cparams = pltpu.CompilerParams(
        dimension_semantics=("parallel", "parallel"),
        vmem_limit_bytes=vmem_limit)

    # ---- pass 1: in-VMEM im2col + conv GEMM; unpadded activation + BN partials
    conv, stats = pl.pallas_call(
        functools.partial(_conv_stats_kernel, ow=OW, oc=OC, gemm_dtype=gemm_dtype),
        out_shape=(jax.ShapeDtypeStruct((N, OH * OW, OC), gemm_dtype),
                   jax.ShapeDtypeStruct((N, n_oh, 8, OCp), jnp.float32)),
        grid=(N, n_oh),
        in_specs=[
            pl.BlockSpec((1, TOH, WY, C4), lambda n, i: (n, i, 0, 0)),
            pl.BlockSpec((1, TOH, WY, C4), lambda n, i: (n, i, 0, 0)),
            pl.BlockSpec((4, C4, OCp), lambda n, i: (0, 0, 0)),
            pl.BlockSpec((1, OCp), lambda n, i: (0, 0)),
        ],
        out_specs=(
            pl.BlockSpec((1, TM, OC), lambda n, i: (n, i, 0)),
            pl.BlockSpec((1, 1, 8, OCp), lambda n, i: (n, i, 0, 0)),
        ),
        compiler_params=cparams,
    )(y_a, y_b, w_q, b_p)

    # ---- finalize train-mode BN statistics (tiny per-channel math)
    ch_sum = jnp.sum(stats[:, :, 0, :OC], axis=(0, 1))          # (OC,)
    ch_ssq = jnp.sum(stats[:, :, 1, :OC], axis=(0, 1))          # (OC,)
    mean = ch_sum / M
    var = jnp.maximum(ch_ssq / M - mean * mean, 0.0)             # biased, clamped
    inv_std = lax.rsqrt(var + EPS)
    g = gamma.astype(jnp.float32)
    scale = (g * inv_std).reshape(1, OC)
    shift = (beta.astype(jnp.float32) - mean * g * inv_std).reshape(1, OC)

    # ---- pass 2: BN apply + LeakyReLU, unpadded in/out
    out = pl.pallas_call(
        _bn_act_kernel,
        out_shape=jax.ShapeDtypeStruct((N, OH * OW, OC), out_dtype),
        grid=(N, n_oh),
        in_specs=[
            pl.BlockSpec((1, TM, OC), lambda n, i: (n, i, 0)),
            pl.BlockSpec((1, OC), lambda n, i: (0, 0)),
            pl.BlockSpec((1, OC), lambda n, i: (0, 0)),
        ],
        out_specs=pl.BlockSpec((1, TM, OC), lambda n, i: (n, i, 0)),
        compiler_params=cparams,
    )(conv, scale, shift)

    y_out = out.reshape(N, OH, OW, OC)                           # lane-dense NHWC
    if not channels_last:
        y_out = y_out.transpose(0, 3, 1, 2)                      # PyTorch NCHW
    if return_stats:
        # PyTorch running_var uses the unbiased estimate: var * M / (M - 1).
        return y_out, (mean, var)
    return y_out


def reference(x, weight, bias, gamma, beta):
    """Pure-JAX reference: conv -> train-mode BN -> LeakyReLU(0.1)."""
    y = lax.conv_general_dilated(
        x, weight, window_strides=(2, 2), padding=((1, 1), (1, 1)),
        dimension_numbers=("NCHW", "OIHW", "NCHW"))
    y = y + bias.reshape(1, -1, 1, 1)
    mean = jnp.mean(y, axis=(0, 2, 3), keepdims=True)
    var = jnp.mean((y - mean) ** 2, axis=(0, 2, 3), keepdims=True)
    y = gamma.reshape(1, -1, 1, 1) * (y - mean) * lax.rsqrt(var + EPS) \
        + beta.reshape(1, -1, 1, 1)
    return jnp.where(y >= 0, y, NEG_SLOPE * y)


if __name__ == "__main__":
    N, C_IN, H, W = 2, 4, 16, 16
    C_OUT = 8

    key = jax.random.PRNGKey(0)
    kx, kw, kb = jax.random.split(key, 3)

    x = jax.random.normal(kx, (N, C_IN, H, W), dtype=jnp.float32)

    # Parameter init matching nn.Conv2d(C_IN, C_OUT, 4, 2, 1) + nn.BatchNorm2d(C_OUT).
    fan_in = C_IN * 4 * 4
    bound = 1.0 / (fan_in ** 0.5)
    weight = jax.random.uniform(kw, (C_OUT, C_IN, 4, 4),
                                minval=-bound, maxval=bound, dtype=jnp.float32)
    bias = jax.random.uniform(kb, (C_OUT,),
                              minval=-bound, maxval=bound, dtype=jnp.float32)
    gamma = jnp.ones((C_OUT,), dtype=jnp.float32)
    beta = jnp.zeros((C_OUT,), dtype=jnp.float32)

    ref = jax.block_until_ready(reference(x, weight, bias, gamma, beta))

    # Exact-semantics path (f32 GEMM + f32 stored activation).
    out_f32 = jax.block_until_ready(
        conv2d_block(x, weight, bias, gamma, beta, gemm_dtype=jnp.float32))
    assert out_f32.shape == (N, C_OUT, H // 2, W // 2), out_f32.shape
    err_f32 = float(jnp.max(jnp.abs(out_f32 - ref)))
    assert err_f32 < 1e-4, err_f32

    # Fast path (bf16 MXU inputs, bf16 stored activation, f32 stats/BN/act).
    out_bf16 = jax.block_until_ready(conv2d_block(x, weight, bias, gamma, beta))
    assert out_bf16.shape == (N, C_OUT, H // 2, W // 2), out_bf16.shape
    err_bf16 = float(jnp.max(jnp.abs(out_bf16 - ref)))
    assert err_bf16 < 5e-2, err_bf16

    print("KERNEL_OK")
</pallas_src>

<mosaic_0001>
module attributes {stable_mosaic.version = 11 : i64} {
  func.func @_conv_stats_kernel(%arg0: i32, %arg1: i32, %arg2: memref<1x8x9x16xf32, #tpu.memory_space<vmem>>, %arg3: memref<1x8x9x16xf32, #tpu.memory_space<vmem>>, %arg4: memref<4x16x128xf32, #tpu.memory_space<vmem>>, %arg5: memref<1x128xf32, #tpu.memory_space<vmem>>, %arg6: memref<1x64x8xf32, #tpu.memory_space<vmem>>, %arg7: memref<1x1x8x128xf32, #tpu.memory_space<vmem>>) attributes {dimension_semantics = [#tpu.dimension_semantics<parallel>, #tpu.dimension_semantics<parallel>], iteration_bounds = array<i64: 2, 1>, scalar_prefetch = 0 : i64, scratch_operands = 0 : i64, tpu.core_type = #tpu.core_type<tc>, window_params = [{transform_indices = @transform_0, window_bounds = array<i64: 1, 8, 9, 16>}, {transform_indices = @transform_1, window_bounds = array<i64: 1, 8, 9, 16>}, {pipeline_mode = #tpu.pipeline_mode<synchronous>, transform_indices = @transform_2, window_bounds = array<i64: 4, 16, 128>}, {pipeline_mode = #tpu.pipeline_mode<synchronous>, transform_indices = @transform_3, window_bounds = array<i64: 1, 128>}, {transform_indices = @transform_4, window_bounds = array<i64: 1, 64, 8>}, {transform_indices = @transform_5, window_bounds = array<i64: 1, 1, 8, 128>}]} {
    %c0 = arith.constant 0 : index
    %c0_0 = arith.constant 0 : index
    %c0_1 = arith.constant 0 : index
    %c0_2 = arith.constant 0 : index
    %0 = vector.load %arg2[%c0, %c0_0, %c0_1, %c0_2] : memref<1x8x9x16xf32, #tpu.memory_space<vmem>>, vector<1x8x9x16xf32>
    %1 = vector.shape_cast %0 : vector<1x8x9x16xf32> to vector<8x9x16xf32>
    %c0_3 = arith.constant 0 : index
    %c0_4 = arith.constant 0 : index
    %c0_5 = arith.constant 0 : index
    %c0_6 = arith.constant 0 : index
    %2 = vector.load %arg3[%c0_3, %c0_4, %c0_5, %c0_6] : memref<1x8x9x16xf32, #tpu.memory_space<vmem>>, vector<1x8x9x16xf32>
    %3 = vector.shape_cast %2 : vector<1x8x9x16xf32> to vector<8x9x16xf32>
    %cst = arith.constant 0.000000e+00 : f32
    %4 = vector.broadcast %cst : f32 to vector<64x128xf32>
    %5 = vector.extract_strided_slice %1 {offsets = [0, 0, 0], sizes = [8, 8, 16], strides = [1, 1, 1]} : vector<8x9x16xf32> to vector<8x8x16xf32>
    %6 = vector.extract_strided_slice %1 {offsets = [0, 1, 0], sizes = [8, 8, 16], strides = [1, 1, 1]} : vector<8x9x16xf32> to vector<8x8x16xf32>
    %7 = vector.extract_strided_slice %3 {offsets = [0, 0, 0], sizes = [8, 8, 16], strides = [1, 1, 1]} : vector<8x9x16xf32> to vector<8x8x16xf32>
    %8 = vector.extract_strided_slice %3 {offsets = [0, 1, 0], sizes = [8, 8, 16], strides = [1, 1, 1]} : vector<8x9x16xf32> to vector<8x8x16xf32>
    %9 = vector.shape_cast %5 : vector<8x8x16xf32> to vector<64x16xf32>
    %c0_7 = arith.constant 0 : index
    %c0_8 = arith.constant 0 : index
    %c0_9 = arith.constant 0 : index
    %10 = vector.load %arg4[%c0_7, %c0_8, %c0_9] : memref<4x16x128xf32, #tpu.memory_space<vmem>>, vector<1x16x128xf32>
    %11 = vector.shape_cast %10 : vector<1x16x128xf32> to vector<16x128xf32>
    %cst_10 = arith.constant dense<0.000000e+00> : vector<64x128xf32>
    %12 = tpu.matmul %9, %11, %cst_10 {dimension_numbers = #tpu.dot_dimension_numbers<[1], [0], [0], [1], [0, 0, 1, 1], [], []>} : vector<64x16xf32>, vector<16x128xf32>, vector<64x128xf32> -> vector<64x128xf32>
    %13 = arith.addf %4, %12 : vector<64x128xf32>
    %14 = vector.shape_cast %6 : vector<8x8x16xf32> to vector<64x16xf32>
    %c1 = arith.constant 1 : index
    %c0_11 = arith.constant 0 : index
    %c0_12 = arith.constant 0 : index
    %15 = vector.load %arg4[%c1, %c0_11, %c0_12] : memref<4x16x128xf32, #tpu.memory_space<vmem>>, vector<1x16x128xf32>
    %16 = vector.shape_cast %15 : vector<1x16x128xf32> to vector<16x128xf32>
    %cst_13 = arith.constant dense<0.000000e+00> : vector<64x128xf32>
    %17 = tpu.matmul %14, %16, %cst_13 {dimension_numbers = #tpu.dot_dimension_numbers<[1], [0], [0], [1], [0, 0, 1, 1], [], []>} : vector<64x16xf32>, vector<16x128xf32>, vector<64x128xf32> -> vector<64x128xf32>
    %18 = arith.addf %13, %17 : vector<64x128xf32>
    %19 = vector.shape_cast %7 : vector<8x8x16xf32> to vector<64x16xf32>
    %c2 = arith.constant 2 : index
    %c0_14 = arith.constant 0 : index
    %c0_15 = arith.constant 0 : index
    %20 = vector.load %arg4[%c2, %c0_14, %c0_15] : memref<4x16x128xf32, #tpu.memory_space<vmem>>, vector<1x16x128xf32>
    %21 = vector.shape_cast %20 : vector<1x16x128xf32> to vector<16x128xf32>
    %cst_16 = arith.constant dense<0.000000e+00> : vector<64x128xf32>
    %22 = tpu.matmul %19, %21, %cst_16 {dimension_numbers = #tpu.dot_dimension_numbers<[1], [0], [0], [1], [0, 0, 1, 1], [], []>} : vector<64x16xf32>, vector<16x128xf32>, vector<64x128xf32> -> vector<64x128xf32>
    %23 = arith.addf %18, %22 : vector<64x128xf32>
    %24 = vector.shape_cast %8 : vector<8x8x16xf32> to vector<64x16xf32>
    %c3 = arith.constant 3 : index
    %c0_17 = arith.constant 0 : index
    %c0_18 = arith.constant 0 : index
    %25 = vector.load %arg4[%c3, %c0_17, %c0_18] : memref<4x16x128xf32, #tpu.memory_space<vmem>>, vector<1x16x128xf32>
    %26 = vector.shape_cast %25 : vector<1x16x128xf32> to vector<16x128xf32>
    %cst_19 = arith.constant dense<0.000000e+00> : vector<64x128xf32>
    %27 = tpu.matmul %24, %26, %cst_19 {dimension_numbers = #tpu.dot_dimension_numbers<[1], [0], [0], [1], [0, 0, 1, 1], [], []>} : vector<64x16xf32>, vector<16x128xf32>, vector<64x128xf32> -> vector<64x128xf32>
    %28 = arith.addf %23, %27 : vector<64x128xf32>
    %c0_20 = arith.constant 0 : index
    %c0_21 = arith.constant 0 : index
    %29 = vector.load %arg5[%c0_20, %c0_21] : memref<1x128xf32, #tpu.memory_space<vmem>>, vector<1x128xf32>
    %30 = vector.broadcast %29 : vector<1x128xf32> to vector<64x128xf32>
    %31 = arith.addf %28, %30 : vector<64x128xf32>
    %32 = vector.extract_strided_slice %31 {offsets = [0, 0], sizes = [64, 8], strides = [1, 1]} : vector<64x128xf32> to vector<64x8xf32>
    %c0_22 = arith.constant 0 : index
    %c0_23 = arith.constant 0 : index
    %c0_24 = arith.constant 0 : index
    %33 = vector.load %arg6[%c0_22, %c0_23, %c0_24] : memref<1x64x8xf32, #tpu.memory_space<vmem>>, vector<1x64x8xf32>
    %34 = vector.shape_cast %33 : vector<1x64x8xf32> to vector<64x8xf32>
    %35 = vector.shape_cast %32 : vector<64x8xf32> to vector<1x64x8xf32>
    tpu.vector_store %arg6[%c0_22, %c0_23, %c0_24], %35 {strides = array<i32>} : memref<1x64x8xf32, #tpu.memory_space<vmem>>, vector<1x64x8xf32>,
    %cst_25 = arith.constant dense<0.000000e+00> : vector<128xf32>
    %36 = vector.multi_reduction <add>, %31, %cst_25 [0] : vector<64x128xf32> to vector<128xf32>
    %37 = vector.shape_cast %36 : vector<128xf32> to vector<1x128xf32>
    %38 = arith.mulf %31, %31 : vector<64x128xf32>
    %cst_26 = arith.constant dense<0.000000e+00> : vector<128xf32>
    %39 = vector.multi_reduction <add>, %38, %cst_26 [0] : vector<64x128xf32> to vector<128xf32>
    %40 = vector.shape_cast %39 : vector<128xf32> to vector<1x128xf32>
    %41 = tpu.iota {dimensions = array<i32: 0>} : vector<8x128xi32>
    %c0_i32 = arith.constant 0 : i32
    %42 = vector.broadcast %c0_i32 : i32 to vector<8x128xi32>
    %43 = arith.cmpi eq, %41, %42 : vector<8x128xi32>
    %cst_27 = arith.constant 0.000000e+00 : f32
    %44 = vector.shape_cast %37 : vector<1x128xf32> to vector<1x128xf32>
    %45 = vector.broadcast %44 : vector<1x128xf32> to vector<8x128xf32>
    %46 = vector.broadcast %cst_27 : f32 to vector<8x128xf32>
    %47 = arith.select %43, %45, %46 : vector<8x128xi1>, vector<8x128xf32>
    %c1_i32 = arith.constant 1 : i32
    %48 = vector.broadcast %c1_i32 : i32 to vector<8x128xi32>
    %49 = arith.cmpi eq, %41, %48 : vector<8x128xi32>
    %cst_28 = arith.constant 0.000000e+00 : f32
    %50 = vector.shape_cast %40 : vector<1x128xf32> to vector<1x128xf32>
    %51 = vector.broadcast %50 : vector<1x128xf32> to vector<8x128xf32>
    %52 = vector.broadcast %cst_28 : f32 to vector<8x128xf32>
    %53 = arith.select %49, %51, %52 : vector<8x128xi1>, vector<8x128xf32>
    %54 = arith.addf %47, %53 : vector<8x128xf32>
    %c0_29 = arith.constant 0 : index
    %c0_30 = arith.constant 0 : index
    %c0_31 = arith.constant 0 : index
    %c0_32 = arith.constant 0 : index
    %55 = vector.load %arg7[%c0_29, %c0_30, %c0_31, %c0_32] : memref<1x1x8x128xf32, #tpu.memory_space<vmem>>, vector<1x1x8x128xf32>
    %56 = vector.shape_cast %55 : vector<1x1x8x128xf32> to vector<8x128xf32>
    %57 = vector.shape_cast %54 : vector<8x128xf32> to vector<1x1x8x128xf32>
    tpu.vector_store %arg7[%c0_29, %c0_30, %c0_31, %c0_32], %57 {strides = array<i32>} : memref<1x1x8x128xf32, #tpu.memory_space<vmem>>, vector<1x1x8x128xf32>,
    return
  }
  func.func @transform_0(%arg0: i32, %arg1: i32) -> (i32, i32, i32, i32) {
    %c0_i32 = arith.constant 0 : i32
    %c0_i32_0 = arith.constant 0 : i32
    %c0_i32_1 = arith.constant 0 : i32
    return %arg0, %arg1, %c0_i32, %c0_i32_0 : i32, i32, i32, i32
  }
  func.func @transform_1(%arg0: i32, %arg1: i32) -> (i32, i32, i32, i32) {
    %c0_i32 = arith.constant 0 : i32
    %c0_i32_0 = arith.constant 0 : i32
    %c0_i32_1 = arith.constant 0 : i32
    return %arg0, %arg1, %c0_i32, %c0_i32_0 : i32, i32, i32, i32
  }
  func.func @transform_2(%arg0: i32, %arg1: i32) -> (i32, i32, i32) {
    %c0_i32 = arith.constant 0 : i32
    %c0_i32_0 = arith.constant 0 : i32
    %c0_i32_1 = arith.constant 0 : i32
    %c0_i32_2 = arith.constant 0 : i32
    return %c0_i32, %c0_i32_0, %c0_i32_1 : i32, i32, i32
  }
  func.func @transform_3(%arg0: i32, %arg1: i32) -> (i32, i32) {
    %c0_i32 = arith.constant 0 : i32
    %c0_i32_0 = arith.constant 0 : i32
    %c0_i32_1 = arith.constant 0 : i32
    return %c0_i32, %c0_i32_0 : i32, i32
  }
  func.func @transform_4(%arg0: i32, %arg1: i32) -> (i32, i32, i32) {
    %c0_i32 = arith.constant 0 : i32
    %c0_i32_0 = arith.constant 0 : i32
    return %arg0, %arg1, %c0_i32 : i32, i32, i32
  }
  func.func @transform_5(%arg0: i32, %arg1: i32) -> (i32, i32, i32, i32) {
    %c0_i32 = arith.constant 0 : i32
    %c0_i32_0 = arith.constant 0 : i32
    %c0_i32_1 = arith.constant 0 : i32
    return %arg0, %arg1, %c0_i32, %c0_i32_0 : i32, i32, i32, i32
  }
}

</mosaic_0001>

<bundles_post_ra>
// kernel: tpu_custom_call.1
= control target key start
LH: loop header
LB: loop body
LE: loop exit
PB: predicated region body
PF: predicated region fallthrough
CT: control target
= control target key end

     0   :  { %11 = vsyncpa [#allocation3], 0  ;;  %s1751_s0 = inlined_call_operand.vmem [shape: f32[2,8,9,16], index: 0, kind: input, shape index: {}]   ;;  %s1752_s1 = inlined_call_operand.vmem [shape: f32[2,8,9,16], index: 1, kind: input, shape index: {}]   ;;  %s1753_s2 = inlined_call_operand.vmem [shape: f32[4,16,128], index: 2, kind: input, shape index: {}]   ;;  %s1754_s3 = inlined_call_operand.vmem [shape: f32[1,128], index: 3, kind: input, shape index: {}]   ;;  %s1755_s4 = inlined_call_operand.vmem [shape: f32[2,64,8], index: 4, kind: output, shape index: {0}]   ;;  %s1756_s5 = inlined_call_operand.hbm [shape: f32[2,1,8,128], index: 5, kind: output, shape index: {1}]  }
   0x1   :  { %13 = vsyncpa [#allocation3 + $0x1], 0  ;;  %s1499_s18 = smov 0   ;;  %s1501_s19 = smov 0  }
   0x2   :  { %s1503_s20 = smov 0   ;;  %s1505_s21 = smov 0  }
   0x3   :  { %s1507_s22 = smov 0   ;;  %s1509_s23 = smov 0  }
   0x4 LB: > { %s1173_s24 = sadd.s32 4294967295, %s1466_s23   ;;  %s1174_s25 = sadd.s32 4294967294, %s1466_s23   ;;  %s1466_s23 = sphi %s1509_s23, %s19_s23   ;;  %s1462_s22 = sphi %s1507_s22, %s1763_s22   ;;  %s1458_s21 = sphi %s1505_s21, %s1762_s21   ;;  %s1454_s20 = sphi %s1503_s20, %s1761_s20   ;;  %s1450_s19 = sphi %s1501_s19, %s1760_s19   ;;  %s1446_s18 = sphi %s1499_s18, %s1759_s18  }
   0x5   : > { %s31_s26 = sadd.s32 1, %s1462_s22  ;;  %s166_s27 = sadd.s32 1, %s1454_s20 }
   0x6   : > { %p33_p0 = scmp.ge.s32.totalorder %s31_s26, 2  ;;  %p176_p1 = scmp.ne.s32.totalorder %s1454_s20, %s1450_s19 }
   0x7   : > { %p177_p2 = scmp.eq.s32.totalorder %s1173_s24, 1  ;;  %p182_p3 = scmp.ne.s32.totalorder %s1450_s19, %s1446_s18 }
   0x8   : > { %s1765_s26 = smov (%p33_p0, %s31_s26), 0  ;;  %p183_p5 = scmp.eq.s32.totalorder %s1174_s25, 1 }
   0x9   : > { %p1539_p4 = por %p177_p2, %p176_p1  ;;  %s161_s29 = ssub.s32 %s1462_s22, %s1765_s26 }
   0xa   : > { %p1177_p6 = scmp.ge.s32.totalorder %s1466_s23, 1  ;;  %p164_p7 = scmp.eq.s32.totalorder %s161_s29, 0 }
   0xb   : > { %p1546_p8 = por %p183_p5, %p182_p3  ;;  %p235_p9 = scmp.lt.s32.totalorder %s1466_s23, 3 }
   0xc   : > { %s1552_s6 = scalar_select %p164_p7, %s1454_s20, %s166_s27  }
   0xd   : > { %p236_p10 = pnand %p1177_p6, %p235_p9 }
   0xe   : > { %p288_p11 = scmp.lt.s32.totalorder (!%p236_p10), %s1458_s21, 1  ;;  %s1225_s9 = sshll.u32 (!%p236_p10), %s1458_s21, 7 }
   0xf   : > { %239 = sbr.rel (%p236_p10) target bundleno = 294 (0x126), region = 36  ;;  %s1036_s14 = scalar_lea.hbm (!%p236_p10), %s1756_s5, %s1225_s9 }
  0x10   : > { %s1468_s24 = smov (!%p236_p10), [#allocation2]  }
  0x11   : > { %s1394_s25 = sshll.u32 (!%p236_p10), %s1468_s24, 4  ;;  %s1395_s25 = int_to_ptr.vmem [resolvable:$false] %s1394_s25 }
  0x14   : > { %v1186_v0 = vld [vmem:[%s1753_s2 + $0x18] sm:$0xff]  ;;  %v352_v1 = vld [vmem:[%s1753_s2 + $0x8] sm:$0xff]  ;;  %v1185_v2 = vld [vmem:[%s1753_s2 + $0x10] sm:$0xff]  ;;  %s1568_s15 = scalar_select %p288_p11, %s1458_s21, 1  ;;  %vm397_vm0 = vcmask 130048   ;;  %vm369_vm1 = vcmask 1046528  }
  0x15   : > { %1271 = vmatprep.subr.mxu0 %v1186_v0  ;;  %1287 = vmatprep.subr.mxu1 %v352_v1  ;;  %v351_v3 = vld [vmem:[%s1753_s2] sm:$0xff]  ;;  %v1204_v4 = vld [vmem:[%s1753_s2 + $0x28] sm:$0xff]  ;;  %v1214_v5 = vld [vmem:[%s1753_s2 + $0x38] sm:$0xff]  ;;  %vm959_vm2 = vcmask 64512   ;;  %s1396_s21 = scalar_lea.vmem %s1395_s25, 256 }
  0x16   : > { %1272 = vmatpush3.msra.mxu0 %v1186_v0  ;;  %1288 = vmatpush3.msra.mxu1 %v352_v1  ;;  %s1228_s27 = sshll.u32 %s1568_s15, 7  ;;  %v1213_v6 = vld [vmem:[%s1753_s2 + $0x30] sm:$0xff]  ;;  %v1203_v20 = vld [vmem:[%s1753_s2 + $0x20] sm:$0xff]  ;;  %s1230_s17 = sshll.u32 %s1568_s15, 6 }
  0x17   : > { %1273 = vmatprep.subr.mxu0 %v1185_v2  ;;  %1289 = vmatprep.subr.mxu1 %v351_v3  ;;  %s1582_s8 = scalar_lea.vmem %s1751_s0, %s1228_s27  ;;  %s1609_s16 = scalar_lea.vmem %s1752_s1, %s1228_s27 }
  0x18   : > { %1274 = vmatpush3.msra.mxu0 %v1185_v2  ;;  %1290 = vmatpush3.msra.mxu1 %v351_v3  ;;  %v319_v7 = vld [vmem:[%s1582_s8] sm:$0xff]  ;;  %v320_v8 = vld [vmem:[%s1582_s8 + $0x8] sm:$0x1]  ;;  %v321_v9 = vld [vmem:[%s1582_s8 + $0x10] sm:$0xff]  ;;  %s1686_s7 = scalar_lea.vmem %s1755_s4, %s1230_s17  ;;  %s284_s15 = sand.u32 1, %s1450_s19  }
  0x19   : > { %1303 = vmatprep.subr.mxu0 %v1204_v4  ;;  %1319 = vmatprep.subr.mxu1 %v1214_v5  ;;  %v370_v10 = vrot.slane %v319_v7, 1  ;;  %v371_v11 = vrot.slane %v320_v8, 1  ;;  %v322_v12 = vld [vmem:[%s1582_s8 + $0x18] sm:$0x1]  ;;  %v373_v13 = vrot.slane %v321_v9, 1  ;;  %v323_v14 = vld [vmem:[%s1582_s8 + $0x20] sm:$0xff] }
  0x1a   : > { %1291 = vmatprep.mubr.msk.f32.mxu1 %vm397_vm0, %v319_v7  ;;  %v374_v15 = vrot.slane %v322_v12, 1  ;;  %v324_v16 = vld [vmem:[%s1582_s8 + $0x28] sm:$0x1]  ;;  %v376_v17 = vrot.slane %v323_v14, 1  ;;  %v325_v18 = vld [vmem:[%s1582_s8 + $0x30] sm:$0xff]  ;;  %v327_v19 = vld [vmem:[%s1582_s8 + $0x40] sm:$0xff] }
  0x1b   : > { %1292 = vmatmul.mubr.msk.f32.vlgmr.msra.gmra.mxu1 %vm397_vm0, %v321_v9  ;;  %v372_v21 = vsel %vm369_vm1, %v370_v10, %v371_v11  ;;  %v377_v22 = vrot.slane %v324_v16, 1  ;;  %v326_v23 = vld [vmem:[%s1582_s8 + $0x38] sm:$0x1]  ;;  %v379_v24 = vrot.slane %v325_v18, 1  ;;  %v328_v25 = vld [vmem:[%s1582_s8 + $0x48] sm:$0x1] }
  0x1c   : > { %1320 = vmatpush3.msra.mxu1 %v1214_v5  ;;  %1294 = vmatprep.mubr.msk.f32.mxu1 %vm397_vm0, %v323_v14  ;;  %v375_v26 = vsel %vm369_vm1, %v373_v13, %v374_v15  ;;  %v380_v27 = vrot.slane %v326_v23, 1  ;;  %v382_v28 = vrot.slane %v327_v19, 1  ;;  %v383_v29 = vrot.slane %v328_v25, 1  ;;  %v329_v30 = vld [vmem:[%s1582_s8 + $0x50] sm:$0xff]  ;;  %v330_v31 = vld [vmem:[%s1582_s8 + $0x58] sm:$0x1] }
  0x1d   : > { %1275 = vmatprep.mubr.msk.f32.mxu0 %vm397_vm0, %v372_v21  ;;  %1321 = vmatprep.subr.mxu1 %v1213_v6  ;;  %v378_v32 = vsel %vm369_vm1, %v376_v17, %v377_v22  ;;  %v331_v33 = vld [vmem:[%s1582_s8 + $0x60] sm:$0xff]  ;;  %v332_v34 = vld [vmem:[%s1582_s8 + $0x68] sm:$0x1]  ;;  %v385_v36 = vrot.slane %v329_v30, 1  ;;  %v386_v37 = vrot.slane %v330_v31, 1  ;;  %v333_v38 = vld [vmem:[%s1582_s8 + $0x70] sm:$0xff] }
  0x1e   : > { %1276 = vmatmul.mubr.msk.f32.vlgmr.msra.gmra.mxu0 %vm397_vm0, %v375_v26  ;;  %1322 = vmatpush3.msra.mxu1 %v1213_v6  ;;  %v381_v35 = vsel %vm369_vm1, %v379_v24, %v380_v27  ;;  %v335_v39 = vld [vmem:[%s1609_s16] sm:$0xff]  ;;  %v384_v40 = vsel %vm369_vm1, %v382_v28, %v383_v29  ;;  %v388_v41 = vrot.slane %v331_v33, 1  ;;  %v389_v42 = vrot.slane %v332_v34, 1  ;;  %v334_v43 = vld [vmem:[%s1582_s8 + $0x78] sm:$0x1]  ;;  %v337_v47 = vld [vmem:[%s1609_s16 + $0x10] sm:$0xff] }
  0x1f   : > { %1304 = vmatpush3.msra.mxu0 %v1204_v4  ;;  %1278 = vmatprep.mubr.msk.f32.mxu0 %vm397_vm0, %v378_v32  ;;  %v336_v44 = vld [vmem:[%s1609_s16 + $0x8] sm:$0x1]  ;;  %v788_v45 = vrot.slane %v335_v39, 1  ;;  %v338_v48 = vld [vmem:[%s1609_s16 + $0x18] sm:$0x1]  ;;  %v387_v49 = vsel %vm369_vm1, %v385_v36, %v386_v37  ;;  %v391_v50 = vrot.slane %v333_v38, 1 }
  0x20   : > { %1295 = vmatmul.mubr.msk.f32.gmra.mxu1 %vm397_vm0, %v325_v18  ;;  %1305 = vmatprep.subr.mxu0 %v1203_v20  ;;  %v789_v46 = vrot.slane %v336_v44, 1  ;;  %v392_v51 = vrot.slane %v334_v43, 1  ;;  %v339_v52 = vld [vmem:[%s1609_s16 + $0x20] sm:$0xff]  ;;  %v340_v53 = vld [vmem:[%s1609_s16 + $0x28] sm:$0x1]  ;;  %v390_v54 = vsel %vm369_vm1, %v388_v41, %v389_v42  ;;  %v791_v55 = vrot.slane %v337_v47, 1 }
  0x21   : > { %1297 = vmatprep.mubr.msk.f32.mxu1 %vm397_vm0, %v327_v19  ;;  %1306 = vmatpush3.msra.mxu0 %v1203_v20  ;;  %v792_v56 = vrot.slane %v338_v48, 1  ;;  %v794_v58 = vrot.slane %v339_v52, 1  ;;  %v795_v59 = vrot.slane %v340_v53, 1  ;;  %v341_v60 = vld [vmem:[%s1609_s16 + $0x30] sm:$0xff]  ;;  %v342_v61 = vld [vmem:[%s1609_s16 + $0x38] sm:$0x1] }
  0x22   : > { %1279 = vmatmul.mubr.msk.f32.gmra.mxu0 %vm397_vm0, %v381_v35  ;;  %v790_v57 = vsel %vm369_vm1, %v788_v45, %v789_v46  ;;  %v393_v62 = vsel %vm369_vm1, %v391_v50, %v392_v51  ;;  %v343_v63 = vld [vmem:[%s1609_s16 + $0x40] sm:$0xff]  ;;  %v344_v0 = vld [vmem:[%s1609_s16 + $0x48] sm:$0x1]  ;;  %v797_v2 = vrot.slane %v341_v60, 1  ;;  %v798_v3 = vrot.slane %v342_v61, 1  ;;  %v345_v7 = vld [vmem:[%s1609_s16 + $0x50] sm:$0xff] }
  0x23   : > { %1281 = vmatprep.mubr.msk.f32.mxu0 %vm397_vm0, %v384_v40  ;;  %v793_v1 = vsel %vm369_vm1, %v791_v55, %v792_v56  ;;  %v796_v4 = vsel %vm369_vm1, %v794_v58, %v795_v59  ;;  %v800_v5 = vrot.slane %v343_v63, 1  ;;  %v801_v6 = vrot.slane %v344_v0, 1  ;;  %v346_v8 = vld [vmem:[%s1609_s16 + $0x58] sm:$0x1]  ;;  %v347_v9 = vld [vmem:[%s1609_s16 + $0x60] sm:$0xff]  ;;  %v349_v17 = vld [vmem:[%s1609_s16 + $0x70] sm:$0xff] }
  0x24   : > { %1298 = vmatmul.mubr.msk.f32.gmra.mxu1 %vm397_vm0, %v329_v30  ;;  %v348_v10 = vld [vmem:[%s1609_s16 + $0x68] sm:$0x1]  ;;  %v799_v11 = vsel %vm369_vm1, %v797_v2, %v798_v3  ;;  %v803_v12 = vrot.slane %v345_v7, 1  ;;  %v804_v13 = vrot.slane %v346_v8, 1  ;;  %v806_v15 = vrot.slane %v347_v9, 1  ;;  %s1178_s8 = sshll.u32 %s284_s15, 3 }
  0x25   : > { %1300 = vmatprep.mubr.msk.f32.mxu1 %vm397_vm0, %v331_v33  ;;  %v802_v14 = vsel %vm369_vm1, %v800_v5, %v801_v6  ;;  %v807_v16 = vrot.slane %v348_v10, 1  ;;  %v350_v18 = vld [vmem:[%s1609_s16 + $0x78] sm:$0x1]  ;;  %v809_v20 = vrot.slane %v349_v17, 1  ;;  %v1681_v46 = vld [vmem:[%s1754_s3] ss:$0 sm:$0xff] }
  0x26   : > { %1282 = vmatmul.mubr.msk.f32.gmra.mxu0 %vm397_vm0, %v387_v49  ;;  %v805_v19 = vsel %vm369_vm1, %v803_v12, %v804_v13  ;;  %v810_v21 = vrot.slane %v350_v18, 1  ;;  %s286_s10 = scalar_lea.vmem [#allocation2], %s1178_s8  ;;  %s1020_s16 = scalar_lea.sflag [#allocation3], %s284_s15 }
  0x27   : > { %1284 = vmatprep.mubr.msk.f32.mxu0 %vm397_vm0, %v390_v54  ;;  %v808_v22 = vsel %vm369_vm1, %v806_v15, %v807_v16  ;;  %s1038_s11 = sshll.u32 %s286_s10, 4  ;;  %s1039_s11 = int_to_ptr.vmem [resolvable:$true] %s1038_s11 }
  0x28   : > { %1301 = vmatmul.mubr.msk.f32.gmra.mxu1 %vm397_vm0, %v333_v38  ;;  %v811_v23 = vsel %vm369_vm1, %v809_v20, %v810_v21  ;;  %s1390_s17 = scalar_lea.vmem %s1039_s11, 128  ;;  %p1397_p1 = scmp.lt.s32.totalorder %s1039_s11, %s1395_s25 }
  0x29   : > { %1323 = vmatprep.mubr.msk.f32.mxu1 %vm397_vm0, %v790_v57  ;;  %p1391_p12 = scmp.ne.s32.totalorder %s1039_s11, %s1390_s17  ;;  %p1398_p2 = scmp.lt.s32.totalorder %s1396_s21, %s1390_s17 }
  0x2a   : > { %1285 = vmatmul.mubr.msk.f32.gmra.mxu0 %vm397_vm0, %v393_v62 }
  0x2b   : > { %1307 = vmatprep.mubr.msk.f32.mxu0 %vm397_vm0, %v335_v39  ;;  %p1392_p13 = pnand %p1391_p12, %p1539_p4  ;;  %p1399_p3 = por %p1398_p2, %p1397_p1 }
  0x2c   : > { %1324 = vmatmul.mubr.msk.f32.vlgmr.msra.gmra.mxu1 %vm397_vm0, %v793_v1 }
  0x2d   : > { %1326 = vmatprep.mubr.msk.f32.mxu1 %vm397_vm0, %v796_v4  ;;  %p1393_p0 = pneg %p1392_p13 }
  0x2e   : > { %1308 = vmatmul.mubr.msk.f32.vlgmr.msra.gmra.mxu0 %vm397_vm0, %v337_v47 }
  0x2f   : > { %1310 = vmatprep.mubr.msk.f32.mxu0 %vm397_vm0, %v339_v52  ;;  %p1400_p5 = pnand %p1399_p3, %p1393_p0 }
  0x30   : > { %1327 = vmatmul.mubr.msk.f32.gmra.mxu1 %vm397_vm0, %v799_v11 }
  0x31   : > { %1329 = vmatprep.mubr.msk.f32.mxu1 %vm397_vm0, %v802_v14 }
  0x32   : > { %1311 = vmatmul.mubr.msk.f32.gmra.mxu0 %vm397_vm0, %v341_v60 }
  0x33   : > { %1313 = vmatprep.mubr.msk.f32.mxu0 %vm397_vm0, %v343_v63 }
  0x34   : > { %1330 = vmatmul.mubr.msk.f32.gmra.mxu1 %vm397_vm0, %v805_v19 }
  0x35   : > { %1332 = vmatprep.mubr.msk.f32.mxu1 %vm397_vm0, %v808_v22 }
  0x36   : > { %1314 = vmatmul.mubr.msk.f32.gmra.mxu0 %vm397_vm0, %v345_v7 }
  0x37   : > { %1316 = vmatprep.mubr.msk.f32.mxu0 %vm397_vm0, %v347_v9 }
  0x38   : > { %1333 = vmatmul.mubr.msk.f32.gmra.mxu1 %vm397_vm0, %v811_v23 }
  0x3a   : > { %1317 = vmatmul.mubr.msk.f32.gmra.mxu0 %vm397_vm0, %v349_v17 }
  0xdb   : > { %v1293_v24 = vpop.f32.mrf.mxu1 }
  0xdd   : > { %v601_v25 = vpop.f32.mrf.mxu1 }
  0xde   : > { %v1277_v26 = vpop.f32.mrf.mxu0 }
  0xdf   : > { %v607_v41 = vadd.f32 %v1293_v24, %v1277_v26 }
  0xe0   : > { %v480_v27 = vpop.f32.mrf.mxu0  ;;  %v1296_v28 = vpop.f32.mrf.mxu1 }
  0xe1   : > { %v602_v44 = vadd.f32 %v601_v25, %v480_v27 }
  0xe2   : > { %v1280_v29 = vpop.f32.mrf.mxu0  ;;  %v611_v30 = vpop.f32.mrf.mxu1 }
  0xe3   : > { %v617_v49 = vadd.f32 %v1296_v28, %v1280_v29 }
  0xe4   : > { %v490_v31 = vpop.f32.mrf.mxu0  ;;  %v1299_v32 = vpop.f32.mrf.mxu1 }
  0xe5   : > { %v612_v54 = vadd.f32 %v611_v30, %v490_v31 }
  0xe6   : > { %v1283_v33 = vpop.f32.mrf.mxu0  ;;  %v621_v34 = vpop.f32.mrf.mxu1 }
  0xe7   : > { %v627_v63 = vadd.f32 %v1299_v32, %v1283_v33 }
  0xe8   : > { %v500_v35 = vpop.f32.mrf.mxu0  ;;  %v1302_v36 = vpop.f32.mrf.mxu1 }
  0xe9   : > { %v622_v1 = vadd.f32 %v621_v34, %v500_v35 }
  0xea   : > { %v1286_v37 = vpop.f32.mrf.mxu0  ;;  %v631_v38 = vpop.f32.mrf.mxu1 }
  0xeb   : > { %v637_v9 = vadd.f32 %v1302_v36, %v1286_v37 }
  0xec   : > { %v510_v39 = vpop.f32.mrf.mxu0  ;;  %v1325_v40 = vpop.f32.mrf.mxu1 }
  0xed   : > { %v632_v21 = vadd.f32 %v631_v38, %v510_v39 }
  0xee   : > { %v1309_v42 = vpop.f32.mrf.mxu0  ;;  %v897_v43 = vpop.f32.mrf.mxu1 }
  0xef   : > { %v773_v45 = vadd.f32 %v1309_v42, %v607_v41 }
  0xf0   : > { %v733_v47 = vpop.f32.mrf.mxu0  ;;  %v1328_v48 = vpop.f32.mrf.mxu1 }
  0xf1   : > { %v937_v50 = vadd.f32 %v1325_v40, %v773_v45  ;;  %v772_v51 = vadd.f32 %v733_v47, %v602_v44 }
  0xf2   : > { %v1312_v52 = vpop.f32.mrf.mxu0  ;;  %v907_v53 = vpop.f32.mrf.mxu1 }
  0xf3   : > { %v952_v55 = vadd.f32 %v1681_v46, %v937_v50  ;;  %v936_v56 = vadd.f32 %v897_v43, %v772_v51  ;;  %v775_v57 = vadd.f32 %v1312_v52, %v617_v49  ;;  %v1002_v51 = vlaneseq }
  0xf4   : > { %v743_v58 = vpop.f32.mrf.mxu0  ;;  %v1331_v59 = vpop.f32.mrf.mxu1 }
  0xf5   : > { %961 = vst.msk [vmem:[%s1686_s7 + $0x8] sm:$0xff] %vm959_vm2, %v952_v55  ;;  %v951_v60 = vadd.f32 %v1681_v46, %v936_v56  ;;  %v939_v61 = vadd.f32 %v1328_v48, %v775_v57  ;;  %v774_v62 = vadd.f32 %v743_v58, %v612_v54  ;;  %v982_v6 = vmul.f32 %v952_v55, %v952_v55 }
  0xf6   : > { %v1315_v0 = vpop.f32.mrf.mxu0  ;;  %v917_v5 = vpop.f32.mrf.mxu1 }
  0xf7   : > { %960 = vst.msk [vmem:[%s1686_s7] sm:$0xff] %vm959_vm2, %v951_v60  ;;  %v981_v2 = vmul.f32 %v951_v60, %v951_v60  ;;  %v954_v3 = vadd.f32 %v1681_v46, %v939_v61  ;;  %v938_v4 = vadd.f32 %v907_v53, %v774_v62  ;;  %v777_v7 = vadd.f32 %v1315_v0, %v627_v63 }
  0xf8   : > { %v753_v8 = vpop.f32.mrf.mxu0  ;;  %v968_v10 = vadd.f32 %v952_v55, %v951_v60  ;;  %v1334_v20 = vpop.f32.mrf.mxu1  ;;  %v1003_v55 = vshrl.u32 %v1002_v51, 7 }
  0xf9   : > { %963 = vst.msk [vmem:[%s1686_s7 + $0x18] sm:$0xff] %vm959_vm2, %v954_v3  ;;  %v953_v11 = vadd.f32 %v1681_v46, %v938_v4  ;;  %v776_v12 = vadd.f32 %v753_v8, %v622_v1  ;;  %v989_v13 = vadd.f32 %v982_v6, %v981_v2  ;;  %v941_v14 = vadd.f32 %v1331_v59, %v777_v7 }
  0xfa   : > { %v1318_v15 = vpop.f32.mrf.mxu0  ;;  %v984_v22 = vmul.f32 %v954_v3, %v954_v3  ;;  %v927_v34 = vpop.f32.mrf.mxu1  ;;  %vm1004_vm3 = vcmp.eq.s32.totalorder %v1003_v55, 0  ;;  %vm1006_vm4 = vcmp.eq.s32.totalorder %v1003_v55, 1 }
  0xfb   : > { %962 = vst.msk [vmem:[%s1686_s7 + $0x10] sm:$0xff] %vm959_vm2, %v953_v11  ;;  %v969_v16 = vadd.f32 %v968_v10, %v953_v11  ;;  %v983_v17 = vmul.f32 %v953_v11, %v953_v11  ;;  %v940_v18 = vadd.f32 %v917_v5, %v776_v12  ;;  %v779_v19 = vadd.f32 %v1318_v15, %v637_v9 }
  0xfc   : > { %v956_v23 = vadd.f32 %v1681_v46, %v941_v14  ;;  %v763_v24 = vpop.f32.mrf.mxu0 }
  0xfd   : > { %v990_v25 = vadd.f32 %v989_v13, %v983_v17  ;;  %v955_v26 = vadd.f32 %v1681_v46, %v940_v18  ;;  %v970_v27 = vadd.f32 %v969_v16, %v954_v3  ;;  %v943_v28 = vadd.f32 %v1334_v20, %v779_v19 }
  0xfe   : > { %965 = vst.msk [vmem:[%s1686_s7 + $0x28] sm:$0xff] %vm959_vm2, %v956_v23  ;;  %v778_v29 = vadd.f32 %v763_v24, %v632_v21  ;;  %v986_v36 = vmul.f32 %v956_v23, %v956_v23 }
  0xff   : > { %964 = vst.msk [vmem:[%s1686_s7 + $0x20] sm:$0xff] %vm959_vm2, %v955_v26  ;;  %v971_v30 = vadd.f32 %v970_v27, %v955_v26  ;;  %v985_v31 = vmul.f32 %v955_v26, %v955_v26  ;;  %v991_v32 = vadd.f32 %v990_v25, %v984_v22  ;;  %v958_v33 = vadd.f32 %v1681_v46, %v943_v28 }
 0x100   : > { %v942_v35 = vadd.f32 %v927_v34, %v778_v29 }
 0x101   : > { %v992_v37 = vadd.f32 %v991_v32, %v985_v31  ;;  %967 = vst.msk [vmem:[%s1686_s7 + $0x38] sm:$0xff] %vm959_vm2, %v958_v33  ;;  %v972_v38 = vadd.f32 %v971_v30, %v956_v23  ;;  %v988_v43 = vmul.f32 %v958_v33, %v958_v33 }
 0x102   : > { %v957_v39 = vadd.f32 %v1681_v46, %v942_v35 }
 0x103   : > { %v993_v40 = vadd.f32 %v992_v37, %v986_v36 }
 0x104   : > { %966 = vst.msk [vmem:[%s1686_s7 + $0x30] sm:$0xff] %vm959_vm2, %v957_v39  ;;  %v973_v41 = vadd.f32 %v972_v38, %v957_v39  ;;  %v987_v42 = vmul.f32 %v957_v39, %v957_v39 }
 0x106   : > { %v974_v44 = vadd.f32 %v973_v41, %v958_v33  ;;  %v994_v45 = vadd.f32 %v993_v40, %v987_v42 }
 0x108   : > { %v975_v47 = vrot.slane %v974_v44, 4  ;;  %v995_v48 = vadd.f32 %v994_v45, %v988_v43 }
 0x10a   : > { %v976_v49 = vadd.f32 %v975_v47, %v974_v44  ;;  %v996_v50 = vrot.slane %v995_v48, 4 }
 0x10c   : > { %v977_v52 = vrot.slane %v976_v49, 2  ;;  %v997_v53 = vadd.f32 %v996_v50, %v995_v48 }
 0x10e   : > { %v978_v54 = vadd.f32 %v977_v52, %v976_v49  ;;  %v998_v46 = vrot.slane %v997_v53, 2 }
 0x110   : > { %v979_v56 = vrot.slane %v978_v54, 1  ;;  %v999_v57 = vadd.f32 %v998_v46, %v997_v53 }
 0x112   : > { %v980_v58 = vadd.f32 %v979_v56, %v978_v54  ;;  %v1000_v59 = vrot.slane %v999_v57, 1 }
 0x114   : > { %v1001_v60 = vadd.f32 %v1000_v59, %v999_v57  ;;  %v1005_v61 = vsel %vm1004_vm3, %v980_v58, 0.0 }
 0x116   : > { %v1007_v62 = vsel %vm1006_vm4, %v1001_v60, 0.0 }
 0x117   : > { %v1008_v63 = vadd.f32 %v1007_v62, %v1005_v61 }
 0x119   : > { %1009 = vst [vmem:[%s286_s10] sm:$0xff] %v1008_v63 }
 0x11a   : > { %1403 = shalt.err (!%p1400_p5)
}
 0x11b   : > { %s1404_s27 = scalar_lea.hbm %s1036_s14, 128  ;;  %s1408_s15 = scalar_lea.hbm %s1756_s5, 256 }
 0x11c   : > { %p1405_p6 = scmp.ne.s32.totalorder %s1036_s14, %s1404_s27  ;;  %p1409_p10 = scmp.lt.s32.totalorder %s1036_s14, %s1756_s5 }
 0x11d   : > { %p1410_p11 = scmp.lt.s32.totalorder %s1408_s15, %s1404_s27 }
 0x11e   : > { %p1406_p7 = pnand %p1405_p6, %p1539_p4 }
 0x11f   : > { %p1411_p12 = por %p1410_p11, %p1409_p10 }
 0x120   : > { %p1407_p9 = pneg %p1406_p7 }
 0x122   : > { %p1412_p13 = pnand %p1411_p12, %p1407_p9 }
 0x124   : > { %1415 = shalt.err (!%p1412_p13)
}
 0x125   : > { %1335 = dma.vmem_to_hbm [thread:$0]  (%p1539_p4), %s1039_s11, 128, %s1036_s14, %s1020_s16  }
 0x126 PF: > { %p1341_p0 = scmp.ge.s32.totalorder %s1466_s23, 2  ;;  %s1062_s10 = sand.u32 1, %s1446_s18  }
 0x127   : > { %s1063_s12 = scalar_lea.sflag [#allocation3], %s1062_s10 }
 0x128   : > { %p1338_p1 = pnand %p1341_p0, %p1546_p8 }
 0x12a   : > { %p1339_p2 = pneg %p1338_p1 }
 0x12c   : > { %1441 = dma.done.wait (%p1339_p2), %s1063_s12, 128  }
 0x12d   : > { %1443 = vsyncadd (%p1339_p2), %s1063_s12, 4294967168  ;;  %s19_s23 = sadd.s32 1, %s1466_s23   ;;  %s1759_s18 = smov %s1450_s19 }
 0x12e   : > { %p16_p3 = scmp.ge.s32.totalorder %s19_s23, 4   ;;  %s1760_s19 = smov %s1454_s20 }
 0x12f   : > { %s1761_s20 = smov %s1552_s6  ;;  %s1762_s21 = smov %s1462_s22 }
 0x130   : > { %s1763_s22 = smov %s1765_s26  ;;  %18 = sbr.rel (!%p16_p3) target bundleno = 4 (0x4), region = 89 }
 0x135   :  { %1068 = vsyncpa [#allocation3], 1 }
 0x136   :  { %1070 = vsyncpa [#allocation3 + $0x1], 1 }

</bundles_post_ra>
